<compile_context>
chip_gen: v7x
topology: tpu7x:2x2x1
jax: 0.10.0
libtpu: 0.0.40
codegen_flags: <defaults>
</compile_context>

<pallas_src>
import functools
import math

import numpy as np

import jax
import jax.numpy as jnp
from jax.experimental import pallas as pl
from jax.experimental.pallas import tpu as pltpu


def _round_up(n, m):
    return ((n + m - 1) // m) * m


def _default_epilogue_dtype(compute_dtype):
    """bf16 epilogues only on bf16-native VPUs (v6e/v7x); f32 on v5e and older."""
    if compute_dtype == jnp.float32:
        return jnp.float32
    try:
        kind = jax.devices()[0].device_kind.lower()
    except Exception:  # pragma: no cover - no device info -> safe default
        return jnp.float32
    if any(g in kind for g in ("v2", "v3", "v4", "v5")):
        return jnp.float32
    return compute_dtype


# --------------------------------------------------------------------------
# Kernel: one batch tile, activations laid out (channels, B_TILE) — batch on
# lanes, channels on sublanes.
# --------------------------------------------------------------------------
def cnn_kernel(x_ref, w1_ref, w2_ref, b2_ref, wfc1_ref, bfc1_ref, wfc2_ref,
               bfc2_ref, out_ref, *, LpC1):
    f32 = jnp.float32

    # conv1 (k=2) over all 2*Lp pooled-consumed windows as ONE banded matmul;
    # the bias is folded in via the constant-1.0 row of x, so no epilogue add.
    #   (2*Lp*C1, Kx) @ (Kx, Bt) -> (2*Lp*C1, Bt) f32
    y1 = jnp.dot(w1_ref[...], x_ref[...], preferred_element_type=f32)

    # MaxPool1d(2, floor) + ReLU in one pass: the weight-row permutation placed
    # even conv windows in rows [0, LpC1) and odd windows in [LpC1, 2*LpC1),
    # so the pool is a single aligned two-slice maximum (no concatenate).
    p = jnp.maximum(jnp.maximum(y1[:LpC1, :], y1[LpC1:2 * LpC1, :]), 0.0)

    # conv2 (k=2) as ONE banded matmul.  Epilogue dtype (bf16 on v6e/v7x, f32
    # on v5e) is carried by the stored bias dtype.
    ep = b2_ref.dtype
    y2 = jnp.dot(w2_ref[...], p.astype(w2_ref.dtype), preferred_element_type=ep)
    y2 = jnp.maximum(y2 + b2_ref[...], 0.0)                   # (L2*C2, Bt)

    # fc1: PyTorch's channel-major flatten is pre-folded into a column
    # permutation of the weight, so this is ONE matmul.
    h = jnp.dot(wfc1_ref[...], y2.astype(wfc1_ref.dtype), preferred_element_type=ep)
    h = jnp.maximum(h + bfc1_ref[...], 0.0)                   # (H, Bt)

    # fc2: with O == 1, a VPU multiply + XLU sublane reduction beats a
    # degenerate M=1 MXU push (worst on v5e's sequential MRF drain).
    if wfc2_ref.shape[1] == 1:
        out = jnp.sum(wfc2_ref[...] * h.astype(f32), axis=0, keepdims=True)   # (1, Bt)
    else:
        out = jax.lax.dot_general(wfc2_ref[...], h.astype(f32),
                                  (((0,), (0,)), ((), ())),
                                  preferred_element_type=f32)                  # (O, Bt)
    out_ref[...] = out + bfc2_ref[...]


# --------------------------------------------------------------------------
# One-time weight re-layout (hoisted off the per-call path).
# --------------------------------------------------------------------------
def prepare_params(params, T, compute_dtype=jnp.bfloat16, epilogue_dtype=None):
    """Rearrange PyTorch-layout weights into the kernel's banded layout. Run once."""
    W1, b1, W2, b2, Wfc1, bfc1, Wfc2, bfc2 = (np.asarray(a, np.float32) for a in params)
    C1, F, K1 = W1.shape
    C2, _, K2 = W2.shape
    H, fc1_in = Wfc1.shape
    O = Wfc2.shape[0]
    assert K1 == 2 and K2 == 2
    assert T % 2 == 0 and T >= 6, "module fc1 sizing is only self-consistent for even lookback T >= 6"
    Lp = (T - 1) // 2              # pooled length (floor mode)
    L2 = Lp - 1                    # conv2 output length
    assert fc1_in == C2 * L2, "fc1 in_features inconsistent with the conv output"
    assert C1 % 8 == 0, "conv1_out_channels must be a multiple of 8 (sublane-aligned pooling)"
    if epilogue_dtype is None:
        epilogue_dtype = _default_epilogue_dtype(compute_dtype)

    # x row count: T*F features + 1 constant bias row, padded to a bf16 sublane
    # multiple so the MXU K dim is tile-aligned.
    Kx = _round_up(T * F + 1, 16)

    # conv1 as one banded matmul over the flattened (time, feature) axis.
    # Row permutation: even conv windows -> rows [0, Lp*C1), odd -> [Lp*C1, 2*Lp*C1),
    # each half ordered by pooled time index, so the pool is max(top, bottom).
    # Column T*F carries the conv1 bias (multiplied by the x bias row of 1.0).
    w1b = np.zeros((2 * Lp * C1, Kx), np.float32)
    for i in range(Lp):
        for half in range(2):
            win = 2 * i + half
            r0 = half * Lp * C1 + i * C1
            for dt in range(2):
                w1b[r0:r0 + C1, (win + dt) * F:(win + dt + 1) * F] = W1[:, :, dt]
            w1b[r0:r0 + C1, T * F] = b1

    # conv2 as one banded matmul on the stacked pooled activations ((t, c) rows).
    w2b = np.zeros((L2 * C2, Lp * C1), np.float32)
    for t in range(L2):
        for dt in range(2):
            w2b[t * C2:(t + 1) * C2, (t + dt) * C1:(t + dt + 1) * C1] = W2[:, :, dt]
    b2b = np.tile(b2, L2)[:, None]

    # Fold PyTorch's channel-major flatten (flat index = c*L2 + t) into a column
    # permutation so the kernel's (t, c)-ordered y2 feeds fc1 directly.
    perm = np.array([c * L2 + t for t in range(L2) for c in range(C2)])
    wfc1p = Wfc1[:, perm]                                    # (H, L2*C2)

    weights = (
        jnp.asarray(w1b, compute_dtype),
        jnp.asarray(w2b, compute_dtype),
        jnp.asarray(b2b, epilogue_dtype),
        jnp.asarray(wfc1p, compute_dtype),
        jnp.asarray(bfc1[:, None], epilogue_dtype),
        jnp.asarray(Wfc2.T, jnp.float32),                    # (H, O): VPU/XLU path for O==1
        jnp.asarray(bfc2[:, None], jnp.float32),
    )
    dims = dict(T=T, F=F, C1=C1, C2=C2, H=H, O=O, Lp=Lp, L2=L2, Kx=Kx,
                compute_dtype=compute_dtype, epilogue_dtype=epilogue_dtype)
    return weights, dims


# --------------------------------------------------------------------------
# Forward wrappers.
# --------------------------------------------------------------------------
def format_input(x, prep):
    """(B, T, F) -> (Kx, B) kernel layout: batch on lanes, bias row = 1.0, zero pad rows.
    For large B, produce this layout upstream and call cnn_forward_preformatted
    directly to avoid the extra HBM round-trip of the transpose."""
    _, d = prep
    T, F, Kx = d["T"], d["F"], d["Kx"]
    B = x.shape[0]
    assert x.shape == (B, T, F)
    dt = d["compute_dtype"]
    xk = jnp.transpose(x, (1, 2, 0)).reshape(T * F, B).astype(dt)
    ones = jnp.ones((1, B), dt)                               # conv1 bias row
    zpad = jnp.zeros((Kx - T * F - 1, B), dt)
    return jnp.concatenate([xk, ones, zpad], axis=0)


def cnn_forward_preformatted(xk, prep, *, block_b=16384, vmem_limit_bytes=None):
    """xk: (Kx, Bp) kernel-layout input (see format_input), Bp % block_b == 0.
    Returns (O, Bp) float32.  For 32K-lane tiles on v5e pass
    vmem_limit_bytes ~= 48-64 MiB."""
    weights, d = prep
    Kx, O, C1, Lp = d["Kx"], d["O"], d["C1"], d["Lp"]
    K_rows, Bp = xk.shape
    assert K_rows == Kx and Bp % block_b == 0

    kernel = functools.partial(cnn_kernel, LpC1=Lp * C1)

    def const_spec(shape):
        # Full-array block, constant index map -> DMA'd once, VMEM-resident
        # across all grid steps.
        return pl.BlockSpec(shape, lambda i: (0,) * len(shape))

    return pl.pallas_call(
        kernel,
        out_shape=jax.ShapeDtypeStruct((O, Bp), jnp.float32),
        grid_spec=pltpu.PrefetchScalarGridSpec(
            num_scalar_prefetch=0,
            grid=(Bp // block_b,),
            in_specs=[pl.BlockSpec((Kx, block_b), lambda i: (0, i))]
                     + [const_spec(w.shape) for w in weights],
            out_specs=pl.BlockSpec((O, block_b), lambda i: (0, i)),
        ),
        compiler_params=pltpu.CompilerParams(
            dimension_semantics=("parallel",),     # v7x: shard batch tiles over both TCs
            vmem_limit_bytes=vmem_limit_bytes),
    )(xk, *weights)


def cnn_forward(x, prep, *, block_b=16384, vmem_limit_bytes=None):
    """x: (B, T, F) float32 — the layout the PyTorch module receives before its
    internal x.permute(0, 2, 1).  Returns (B, output_size) float32."""
    _, d = prep
    O = d["O"]
    B = x.shape[0]

    block_b = _round_up(block_b, 128)
    Bp128 = _round_up(B, 128)
    bt = min(block_b, Bp128)
    # v7x two-TensorCore rule: if the batch fits in <= 2 tiles, split it into
    # (at least) 2 so the parallel grid axis can use both cores.
    if 128 < Bp128 <= 2 * block_b:
        bt = min(bt, _round_up((Bp128 + 1) // 2, 128))
    Bp = _round_up(B, bt)

    # Per-call layout plumbing (a single fused XLA copy under jit):
    # batch -> lanes, bias row, dtype cast, zero-pad to whole tiles.
    xk = format_input(x, prep)
    if Bp != B:
        xk = jnp.pad(xk, ((0, 0), (0, Bp - B)))

    out = cnn_forward_preformatted(xk, prep, block_b=bt,
                                   vmem_limit_bytes=vmem_limit_bytes)   # (O, Bp)
    return out[:, :B].T                                                 # (B, O)


# --------------------------------------------------------------------------
# Pure-JAX replica of CNNModel.forward (independent reference).
# --------------------------------------------------------------------------
def torch_reference(x, params):
    W1, b1, W2, b2, Wfc1, bfc1, Wfc2, bfc2 = params
    B = x.shape[0]
    C1, C2 = W1.shape[0], W2.shape[0]
    xp = jnp.transpose(x, (0, 2, 1))      # (B, F, T) == x.permute(0, 2, 1)
    T = xp.shape[2]
    y1 = jnp.stack([jnp.einsum('bik,oik->bo', xp[:, :, t:t + 2], W1)
                    for t in range(T - 1)], axis=-1) + b1[None, :, None]
    y1 = jnp.maximum(y1, 0.0)             # (B, C1, T-1)
    L1 = y1.shape[2]
    p = jnp.max(y1[:, :, :(L1 // 2) * 2].reshape(B, C1, L1 // 2, 2), axis=-1)
    Lp = p.shape[2]
    y2 = jnp.stack([jnp.einsum('bik,oik->bo', p[:, :, t:t + 2], W2)
                    for t in range(Lp - 1)], axis=-1) + b2[None, :, None]
    y2 = jnp.maximum(y2, 0.0)             # (B, C2, Lp-1)
    flat = y2.reshape(B, -1)              # channel-major flatten, like .view()
    h = jnp.maximum(flat @ Wfc1.T + bfc1, 0.0)
    return h @ Wfc2.T + bfc2


def init_params(key, F, T, C1, C2, H, O):
    def u(k, shape, fan_in):
        bound = 1.0 / math.sqrt(fan_in)
        return jax.random.uniform(k, shape, jnp.float32, -bound, bound)

    ks = jax.random.split(key, 8)
    fc1_in = C2 * ((T - 2) // 2 - 1)      # module's own formula (valid for even T)
    W1 = u(ks[0], (C1, F, 2), F * 2)
    b1 = u(ks[1], (C1,), F * 2)
    W2 = u(ks[2], (C2, C1, 2), C1 * 2)
    b2 = u(ks[3], (C2,), C1 * 2)
    Wfc1 = u(ks[4], (H, fc1_in), fc1_in)
    bfc1 = u(ks[5], (H,), fc1_in)
    Wfc2 = u(ks[6], (O, H), H)
    bfc2 = u(ks[7], (O,), H)
    return (W1, b1, W2, b2, Wfc1, bfc1, Wfc2, bfc2)


if __name__ == "__main__":
    B, T, F = 2, 8, 5                     # batch, lookback, features
    C1, C2, H, O = 8, 16, 32, 1           # conv1_out, conv2_out, fc1_units, output_size

    key = jax.random.PRNGKey(0)
    pkey, xkey, xkey2 = jax.random.split(key, 3)
    params = init_params(pkey, F, T, C1, C2, H, O)
    x = jax.random.normal(xkey, (B, T, F), jnp.float32)
    ref = torch_reference(x, params)

    # 1) f32 compute + f32 epilogue: checks the banded/fused/permuted kernel logic.
    prep_f32 = prepare_params(params, T, compute_dtype=jnp.float32)
    fwd_f32 = jax.jit(functools.partial(cnn_forward, prep=prep_f32, block_b=128))
    out_f32 = jax.block_until_ready(fwd_f32(x))
    assert out_f32.shape == (B, O), out_f32.shape
    assert jnp.allclose(out_f32, ref, rtol=2e-2, atol=2e-2), (out_f32, ref)

    # 2) bf16 production path (bf16 HBM DMA + MXU inputs; epilogue dtype
    #    auto-selected per TPU generation: bf16 on v6e/v7x, f32 on v5e).
    prep_bf16 = prepare_params(params, T, compute_dtype=jnp.bfloat16)
    fwd_bf16 = jax.jit(functools.partial(cnn_forward, prep=prep_bf16))
    out_bf16 = jax.block_until_ready(fwd_bf16(x))
    assert out_bf16.shape == (B, O), out_bf16.shape
    assert jnp.allclose(out_bf16, ref, rtol=1e-1, atol=1e-1), (out_bf16, ref)

    # 3) Multi-tile grid path: batch spanning several tiles, padded final tile.
    Bbig = 300
    xb = jax.random.normal(xkey2, (Bbig, T, F), jnp.float32)
    refb = torch_reference(xb, params)
    fwd_big = jax.jit(functools.partial(cnn_forward, prep=prep_bf16, block_b=128))
    outb = jax.block_until_ready(fwd_big(xb))
    assert outb.shape == (Bbig, O), outb.shape
    assert jnp.allclose(outb, refb, rtol=1e-1, atol=1e-1), (outb, refb)

    print("KERNEL_OK")
</pallas_src>

<mosaic_0001>
module attributes {stable_mosaic.version = 11 : i64} {
  func.func @cnn_kernel(%arg0: i32, %arg1: memref<48x128xf32, #tpu.memory_space<vmem>>, %arg2: memref<48x48xf32, #tpu.memory_space<vmem>>, %arg3: memref<32x24xf32, #tpu.memory_space<vmem>>, %arg4: memref<32x1xf32, #tpu.memory_space<vmem>>, %arg5: memref<32x32xf32, #tpu.memory_space<vmem>>, %arg6: memref<32x1xf32, #tpu.memory_space<vmem>>, %arg7: memref<32x1xf32, #tpu.memory_space<vmem>>, %arg8: memref<1x1xf32, #tpu.memory_space<vmem>>, %arg9: memref<1x128xf32, #tpu.memory_space<vmem>>) attributes {dimension_semantics = [#tpu.dimension_semantics<parallel>], iteration_bounds = array<i64: 1>, scalar_prefetch = 0 : i64, scratch_operands = 0 : i64, tpu.core_type = #tpu.core_type<tc>, window_params = [{transform_indices = @transform_0, window_bounds = array<i64: 48, 128>}, {pipeline_mode = #tpu.pipeline_mode<synchronous>, transform_indices = @transform_1, window_bounds = array<i64: 48, 48>}, {pipeline_mode = #tpu.pipeline_mode<synchronous>, transform_indices = @transform_2, window_bounds = array<i64: 32, 24>}, {pipeline_mode = #tpu.pipeline_mode<synchronous>, transform_indices = @transform_3, window_bounds = array<i64: 32, 1>}, {pipeline_mode = #tpu.pipeline_mode<synchronous>, transform_indices = @transform_4, window_bounds = array<i64: 32, 32>}, {pipeline_mode = #tpu.pipeline_mode<synchronous>, transform_indices = @transform_5, window_bounds = array<i64: 32, 1>}, {pipeline_mode = #tpu.pipeline_mode<synchronous>, transform_indices = @transform_6, window_bounds = array<i64: 32, 1>}, {pipeline_mode = #tpu.pipeline_mode<synchronous>, transform_indices = @transform_7, window_bounds = array<i64: 1, 1>}, {transform_indices = @transform_8, window_bounds = array<i64: 1, 128>}]} {
    %c0 = arith.constant 0 : index
    %c0_0 = arith.constant 0 : index
    %0 = vector.load %arg2[%c0, %c0_0] : memref<48x48xf32, #tpu.memory_space<vmem>>, vector<48x48xf32>
    %c0_1 = arith.constant 0 : index
    %c0_2 = arith.constant 0 : index
    %1 = vector.load %arg1[%c0_1, %c0_2] : memref<48x128xf32, #tpu.memory_space<vmem>>, vector<48x128xf32>
    %cst = arith.constant dense<0.000000e+00> : vector<48x128xf32>
    %2 = tpu.matmul %0, %1, %cst {dimension_numbers = #tpu.dot_dimension_numbers<[1], [0], [0], [1], [0, 0, 1, 1], [], []>} : vector<48x48xf32>, vector<48x128xf32>, vector<48x128xf32> -> vector<48x128xf32>
    %3 = vector.extract_strided_slice %2 {offsets = [0, 0], sizes = [24, 128], strides = [1, 1]} : vector<48x128xf32> to vector<24x128xf32>
    %4 = vector.extract_strided_slice %2 {offsets = [24, 0], sizes = [24, 128], strides = [1, 1]} : vector<48x128xf32> to vector<24x128xf32>
    %5 = arith.maximumf %3, %4 : vector<24x128xf32>
    %cst_3 = arith.constant 0.000000e+00 : f32
    %6 = vector.broadcast %cst_3 : f32 to vector<24x128xf32>
    %7 = arith.maximumf %5, %6 : vector<24x128xf32>
    %c0_4 = arith.constant 0 : index
    %c0_5 = arith.constant 0 : index
    %8 = vector.load %arg3[%c0_4, %c0_5] : memref<32x24xf32, #tpu.memory_space<vmem>>, vector<32x24xf32>
    %cst_6 = arith.constant dense<0.000000e+00> : vector<32x128xf32>
    %9 = tpu.matmul %8, %7, %cst_6 {dimension_numbers = #tpu.dot_dimension_numbers<[1], [0], [0], [1], [0, 0, 1, 1], [], []>} : vector<32x24xf32>, vector<24x128xf32>, vector<32x128xf32> -> vector<32x128xf32>
    %c0_7 = arith.constant 0 : index
    %c0_8 = arith.constant 0 : index
    %10 = vector.load %arg4[%c0_7, %c0_8] : memref<32x1xf32, #tpu.memory_space<vmem>>, vector<32x1xf32>
    %11 = vector.broadcast %10 : vector<32x1xf32> to vector<32x128xf32>
    %12 = arith.addf %9, %11 : vector<32x128xf32>
    %cst_9 = arith.constant 0.000000e+00 : f32
    %13 = vector.broadcast %cst_9 : f32 to vector<32x128xf32>
    %14 = arith.maximumf %12, %13 : vector<32x128xf32>
    %c0_10 = arith.constant 0 : index
    %c0_11 = arith.constant 0 : index
    %15 = vector.load %arg5[%c0_10, %c0_11] : memref<32x32xf32, #tpu.memory_space<vmem>>, vector<32x32xf32>
    %cst_12 = arith.constant dense<0.000000e+00> : vector<32x128xf32>
    %16 = tpu.matmul %15, %14, %cst_12 {dimension_numbers = #tpu.dot_dimension_numbers<[1], [0], [0], [1], [0, 0, 1, 1], [], []>} : vector<32x32xf32>, vector<32x128xf32>, vector<32x128xf32> -> vector<32x128xf32>
    %c0_13 = arith.constant 0 : index
    %c0_14 = arith.constant 0 : index
    %17 = vector.load %arg6[%c0_13, %c0_14] : memref<32x1xf32, #tpu.memory_space<vmem>>, vector<32x1xf32>
    %18 = vector.broadcast %17 : vector<32x1xf32> to vector<32x128xf32>
    %19 = arith.addf %16, %18 : vector<32x128xf32>
    %cst_15 = arith.constant 0.000000e+00 : f32
    %20 = vector.broadcast %cst_15 : f32 to vector<32x128xf32>
    %21 = arith.maximumf %19, %20 : vector<32x128xf32>
    %c0_16 = arith.constant 0 : index
    %c0_17 = arith.constant 0 : index
    %22 = vector.load %arg7[%c0_16, %c0_17] : memref<32x1xf32, #tpu.memory_space<vmem>>, vector<32x1xf32>
    %23 = vector.broadcast %22 : vector<32x1xf32> to vector<32x128xf32>
    %24 = arith.mulf %23, %21 : vector<32x128xf32>
    %cst_18 = arith.constant dense<0.000000e+00> : vector<128xf32>
    %25 = vector.multi_reduction <add>, %24, %cst_18 [0] : vector<32x128xf32> to vector<128xf32>
    %26 = vector.shape_cast %25 : vector<128xf32> to vector<1x128xf32>
    %c0_19 = arith.constant 0 : index
    %c0_20 = arith.constant 0 : index
    %27 = vector.load %arg8[%c0_19, %c0_20] : memref<1x1xf32, #tpu.memory_space<vmem>>, vector<1x1xf32>
    %28 = vector.broadcast %27 : vector<1x1xf32> to vector<1x128xf32>
    %29 = arith.addf %26, %28 : vector<1x128xf32>
    %c0_21 = arith.constant 0 : index
    %c0_22 = arith.constant 0 : index
    %30 = vector.load %arg9[%c0_21, %c0_22] : memref<1x128xf32, #tpu.memory_space<vmem>>, vector<1x128xf32>
    tpu.vector_store %arg9[%c0_21, %c0_22], %29 {strides = array<i32>} : memref<1x128xf32, #tpu.memory_space<vmem>>, vector<1x128xf32>,
    return
  }
  func.func @transform_0(%arg0: i32) -> (i32, i32) {
    %c0_i32 = arith.constant 0 : i32
    %c0_i32_0 = arith.constant 0 : i32
    return %c0_i32, %arg0 : i32, i32
  }
  func.func @transform_1(%arg0: i32) -> (i32, i32) {
    %c0_i32 = arith.constant 0 : i32
    %c0_i32_0 = arith.constant 0 : i32
    %c0_i32_1 = arith.constant 0 : i32
    return %c0_i32, %c0_i32_0 : i32, i32
  }
  func.func @transform_2(%arg0: i32) -> (i32, i32) {
    %c0_i32 = arith.constant 0 : i32
    %c0_i32_0 = arith.constant 0 : i32
    %c0_i32_1 = arith.constant 0 : i32
    return %c0_i32, %c0_i32_0 : i32, i32
  }
  func.func @transform_3(%arg0: i32) -> (i32, i32) {
    %c0_i32 = arith.constant 0 : i32
    %c0_i32_0 = arith.constant 0 : i32
    %c0_i32_1 = arith.constant 0 : i32
    return %c0_i32, %c0_i32_0 : i32, i32
  }
  func.func @transform_4(%arg0: i32) -> (i32, i32) {
    %c0_i32 = arith.constant 0 : i32
    %c0_i32_0 = arith.constant 0 : i32
    %c0_i32_1 = arith.constant 0 : i32
    return %c0_i32, %c0_i32_0 : i32, i32
  }
  func.func @transform_5(%arg0: i32) -> (i32, i32) {
    %c0_i32 = arith.constant 0 : i32
    %c0_i32_0 = arith.constant 0 : i32
    %c0_i32_1 = arith.constant 0 : i32
    return %c0_i32, %c0_i32_0 : i32, i32
  }
  func.func @transform_6(%arg0: i32) -> (i32, i32) {
    %c0_i32 = arith.constant 0 : i32
    %c0_i32_0 = arith.constant 0 : i32
    %c0_i32_1 = arith.constant 0 : i32
    return %c0_i32, %c0_i32_0 : i32, i32
  }
  func.func @transform_7(%arg0: i32) -> (i32, i32) {
    %c0_i32 = arith.constant 0 : i32
    %c0_i32_0 = arith.constant 0 : i32
    %c0_i32_1 = arith.constant 0 : i32
    return %c0_i32, %c0_i32_0 : i32, i32
  }
  func.func @transform_8(%arg0: i32) -> (i32, i32) {
    %c0_i32 = arith.constant 0 : i32
    %c0_i32_0 = arith.constant 0 : i32
    return %c0_i32, %arg0 : i32, i32
  }
}

</mosaic_0001>

<bundles_post_ra>
// kernel: cnn_forward.1
= control target key start
LH: loop header
LB: loop body
LE: loop exit
PB: predicated region body
PF: predicated region fallthrough
CT: control target
= control target key end

     0   :  { %vm43_vm0 = vcmask 392192   ;;  %vm191_vm1 = vcmask 195584   ;;  %v591_v16 = vmov 0   ;;  %vm321_vm2 = vcmask 261120   ;;  %s753_s0 = inlined_call_operand.vmem [shape: f32[48,128], index: 0, kind: input, shape index: {}]   ;;  %s754_s1 = inlined_call_operand.vmem [shape: f32[48,48], index: 1, kind: input, shape index: {}]   ;;  %s755_s2 = inlined_call_operand.vmem [shape: f32[32,24], index: 2, kind: input, shape index: {}]   ;;  %s756_s3 = inlined_call_operand.vmem [shape: f32[32,1], index: 3, kind: input, shape index: {}]   ;;  %s757_s7 = inlined_call_operand.<no memory space> [shape: f32[1,1], index: 7, kind: input, shape index: {}]   ;;  %s758_s5 = inlined_call_operand.vmem [shape: f32[32,1], index: 5, kind: input, shape index: {}]   ;;  %s759_s6 = inlined_call_operand.vmem [shape: f32[32,1], index: 6, kind: input, shape index: {}]   ;;  %s760_s4 = inlined_call_operand.vmem [shape: f32[32,32], index: 4, kind: input, shape index: {}]   ;;  %s761_s8 = inlined_call_operand.vmem [shape: f32[1,128], index: 8, kind: output, shape index: {}]  }
   0x1   :  { %v37_v0 = vld [vmem:[%s753_s0] sm:$0xff]  ;;  %v38_v1 = vld [vmem:[%s753_s0 + $0x8] sm:$0xff]  ;;  %v39_v2 = vld [vmem:[%s753_s0 + $0x10] sm:$0xff]  ;;  %589 = vset.pattern.permute.xlu0 %v591_v16  ;;  %590 = vset.pattern.permute.xlu1 %v591_v16  ;;  %v13_v19 = vstv %s757_s7 }
   0x2   :  { %v564_v3 = vpack.c.bf16 %v38_v1, %v37_v0  ;;  %v40_v4 = vld [vmem:[%s753_s0 + $0x18] sm:$0xff]  ;;  %v41_v6 = vld [vmem:[%s753_s0 + $0x20] sm:$0xff]  ;;  %v42_v7 = vld [vmem:[%s753_s0 + $0x28] sm:$0xff]  ;;  %14 = vst [vmem:[#allocation2] sm:$0x1] %v13_v19 }
   0x3   :  { %v568_v5 = vpack.c.bf16 %v40_v4, %v39_v2  ;;  %v31_v8 = vld [vmem:[%s754_s1] sm:$0xff]  ;;  %v572_v9 = vpack.c.bf16 %v42_v7, %v41_v6  ;;  %v32_v10 = vld [vmem:[%s754_s1 + $0x8] sm:$0xff]  ;;  %v33_v11 = vld [vmem:[%s754_s1 + $0x10] sm:$0xff] }
   0x4   :  { %565 = vmatprep.subr.bf16.mxu0 %v564_v3  ;;  %529 = vmatprep.mubr.msk.f32.mxu0 %vm43_vm0, %v31_v8  ;;  %v34_v12 = vld [vmem:[%s754_s1 + $0x18] sm:$0xff]  ;;  %v35_v13 = vld [vmem:[%s754_s1 + $0x20] sm:$0xff]  ;;  %v36_v14 = vld [vmem:[%s754_s1 + $0x28] sm:$0xff] }
   0x5   :  { %567 = vmatpush3.bf16.msra.mxu0 %v564_v3  ;;  %v163_v15 = vld [vmem:[%s755_s2] sm:$0xff]  ;;  %v169_v18 = vld [vmem:[%s756_s3 + $0x10] sm:$0xff]  ;;  %v168_v20 = vld [vmem:[%s756_s3 + $0x8] sm:$0xff] }
   0x6   :  { %569 = vmatprep.subr.bf16.mxu0 %v568_v5  ;;  %544 = vmatprep.mubr.msk.f32.mxu1 %vm191_vm1, %v163_v15  ;;  %v167_v17 = vld [vmem:[%s756_s3] sm:$0xff]  ;;  %v170_v21 = vld [vmem:[%s756_s3 + $0x18] sm:$0xff]  ;;  %v298_v23 = vld [vmem:[%s758_s5 + $0x8] sm:$0xff] }
   0x7   :  { %173 = vperm.xlu0 %589, %v167_v17   ;;  %183 = vperm.xlu1 %590, %v169_v18   ;;  %v297_v22 = vld [vmem:[%s758_s5] sm:$0xff]  ;;  %v299_v24 = vld [vmem:[%s758_s5 + $0x10] sm:$0xff]  ;;  %v300_v25 = vld [vmem:[%s758_s5 + $0x18] sm:$0xff] }
   0x8   :  { %v423_v26 = vld [vmem:[%s759_s6] sm:$0xff]  ;;  %v424_v27 = vld [vmem:[%s759_s6 + $0x8] sm:$0xff]  ;;  %v425_v28 = vld [vmem:[%s759_s6 + $0x10] sm:$0xff] }
   0x9   :  { %571 = vmatpush3.bf16.msra.mxu0 %v568_v5  ;;  %v426_v29 = vld [vmem:[%s759_s6 + $0x18] sm:$0xff]  ;;  %v460_v30 = vld [vmem:[#allocation2] sm:$0x1]  ;;  %v164_v44 = vld [vmem:[%s755_s2 + $0x8] sm:$0xff] }
   0xa   :  { %573 = vmatprep.subr.bf16.mxu0 %v572_v9  ;;  %v165_v45 = vld [vmem:[%s755_s2 + $0x10] sm:$0xff]  ;;  %v166_v46 = vld [vmem:[%s755_s2 + $0x18] sm:$0xff]  ;;  %v293_v47 = vld [vmem:[%s760_s4] sm:$0xff] }
   0xb   :  { %178 = vperm.xlu0 %589, %v168_v20   ;;  %188 = vperm.xlu1 %590, %v170_v21   ;;  %v294_v2 = vld [vmem:[%s760_s4 + $0x8] sm:$0xff]  ;;  %v295_v3 = vld [vmem:[%s760_s4 + $0x10] sm:$0xff]  ;;  %v296_v4 = vld [vmem:[%s760_s4 + $0x18] sm:$0xff] }
   0xd   :  { %575 = vmatpush3.bf16.msra.mxu0 %v572_v9 }
   0xf   :  { %303 = vperm.xlu0 %589, %v297_v22   ;;  %308 = vperm.xlu1 %590, %v298_v23  }
  0x10   :  { %530 = vmatmul.mubr.msk.f32.vlgmr.msra.gmra.mrb[0].mxu0 %vm43_vm0, %v32_v10 }
  0x11   :  { %532 = vmatprep.mubr.msk.f32.mxu0 %vm43_vm0, %v33_v11 }
  0x13   :  { %313 = vperm.xlu0 %589, %v299_v24   ;;  %318 = vperm.xlu1 %590, %v300_v25  }
  0x14   :  { %533 = vmatmul.mubr.msk.f32.gmra.mrb[2].mxu0 %vm43_vm0, %v34_v12 }
  0x15   :  { %535 = vmatprep.mubr.msk.f32.mxu0 %vm43_vm0, %v35_v13 }
  0x17   :  { %429 = vperm.xlu0 %589, %v423_v26   ;;  %434 = vperm.xlu1 %590, %v424_v27  }
  0x18   :  { %536 = vmatmul.mubr.msk.f32.gmra.mrb[4].mxu0 %vm43_vm0, %v36_v14 }
  0x1b   :  { %439 = vperm.xlu0 %589, %v425_v28   ;;  %444 = vperm.xlu1 %590, %v426_v29  }
  0x1f   :  { %463 = vperm.xlu0 %589, %v460_v30  }
  0x86   :  { %v174_v48 = vpop.permute.xlu0 %173  ;;  %v184_v49 = vpop.permute.xlu1 %183 }
  0x8a   :  { %v179_v50 = vpop.permute.xlu0 %178  ;;  %v189_v56 = vpop.permute.xlu1 %188 }
  0x8e   :  { %v304_v5 = vpop.permute.xlu0 %303  ;;  %v309_v6 = vpop.permute.xlu1 %308 }
  0x92   :  { %v314_v7 = vpop.permute.xlu0 %313  ;;  %v319_v8 = vpop.permute.xlu1 %318 }
  0x96   :  { %v430_v13 = vpop.permute.xlu0 %429  ;;  %v435_v15 = vpop.permute.xlu1 %434 }
  0x9a   :  { %v440_v26 = vpop.permute.xlu0 %439  ;;  %v445_v28 = vpop.permute.xlu1 %444 }
  0xe3   :  { %v531_v31 = vpop.f32.mrb[0].mxu0 }
  0xe4   :  { %v128_v32 = vpop.f32.mrb[1].mxu0 }
  0xe7   :  { %v534_v33 = vpop.f32.mrb[2].mxu0 }
  0xe8   :  { %v157_v34 = vmax.f32 %v128_v32, %v534_v33  ;;  %v138_v35 = vpop.f32.mrb[3].mxu0 }
  0xea   :  { %v160_v40 = vmax.f32 %v157_v34, 0.0 }
  0xeb   :  { %v537_v36 = vpop.f32.mrb[4].mxu0 }
  0xec   :  { %v159_v37 = vmax.f32 %v138_v35, %v537_v36  ;;  %v148_v38 = vpop.f32.mrb[5].mxu0 }
  0xed   :  { %v158_v39 = vmax.f32 %v531_v31, %v148_v38  ;;  %v466_v31 = vlaneseq }
  0xee   :  { %v162_v43 = vmax.f32 %v159_v37, 0.0 }
  0xef   :  { %v161_v41 = vmax.f32 %v158_v39, 0.0  ;;  %v467_v34 = vshrl.u32 %v466_v31, 7  ;;  %v464_v39 = vpop.permute.xlu0 %463 }
  0xf1   :  { %v576_v42 = vpack.c.bf16 %v161_v41, %v160_v40  ;;  %v468_v37 = vsub.s32 0, %v467_v34 }
  0xf3   :  { %577 = vmatprep.subr.bf16.mxu1 %v576_v42  ;;  %v469_v41 = vrot.slane %v464_v39, %v468_v37 }
  0xf4   :  { %579 = vmatpush3.bf16.msra.mxu1 %v576_v42 }
  0xf5   :  { %542 = vmatprep.subr.mxu1 %v162_v43 }
  0xf8   :  { %543 = vmatpush3.msra.mxu1 %v162_v43 }
  0xf9   :  { %545 = vmatmul.mubr.msk.f32.vlgmr.msra.gmra.mrb[0].mxu1 %vm191_vm1, %v164_v44 }
  0xfa   :  { %547 = vmatprep.mubr.msk.f32.mxu1 %vm191_vm1, %v165_v45 }
  0xfd   :  { %548 = vmatmul.mubr.msk.f32.gmra.mrb[2].mxu1 %vm191_vm1, %v166_v46 }
  0xfe   :  { %558 = vmatprep.mubr.msk.f32.mxu1 %vm321_vm2, %v293_v47 }
 0x1cc   :  { %v546_v51 = vpop.f32.mrb[0].mxu1 }
 0x1cd   :  { %v276_v52 = vadd.f32 %v546_v51, %v179_v50  ;;  %v270_v53 = vpop.f32.mrb[1].mxu1 }
 0x1ce   :  { %v271_v54 = vadd.f32 %v270_v53, %v174_v48 }
 0x1cf   :  { %v290_v55 = vmax.f32 %v276_v52, 0.0 }
 0x1d0   :  { %v289_v57 = vmax.f32 %v271_v54, 0.0  ;;  %v549_v58 = vpop.f32.mrb[2].mxu1 }
 0x1d1   :  { %v286_v59 = vadd.f32 %v549_v58, %v189_v56  ;;  %v280_v60 = vpop.f32.mrb[3].mxu1 }
 0x1d2   :  { %v580_v61 = vpack.c.bf16 %v290_v55, %v289_v57  ;;  %v281_v62 = vadd.f32 %v280_v60, %v184_v49 }
 0x1d3   :  { %v292_v63 = vmax.f32 %v286_v59, 0.0 }
 0x1d4   :  { %v291_v0 = vmax.f32 %v281_v62, 0.0  ;;  %581 = vmatprep.subr.bf16.mxu1 %v580_v61 }
 0x1d5   :  { %583 = vmatpush3.bf16.msra.mxu1 %v580_v61 }
 0x1d6   :  { %v584_v1 = vpack.c.bf16 %v292_v63, %v291_v0 }
 0x1d8   :  { %585 = vmatprep.subr.bf16.mxu1 %v584_v1 }
 0x1d9   :  { %587 = vmatpush3.bf16.msra.mxu1 %v584_v1 }
 0x1dc   :  { %559 = vmatmul.mubr.msk.f32.vlgmr.msra.gmra.mrb[4].mxu1 %vm321_vm2, %v294_v2 }
 0x1dd   :  { %561 = vmatprep.mubr.msk.f32.mxu1 %vm321_vm2, %v295_v3 }
 0x1e0   :  { %562 = vmatmul.mubr.msk.f32.gmra.mrb[6].mxu1 %vm321_vm2, %v296_v4 }
 0x2af   :  { %v560_v9 = vpop.f32.mrb[4].mxu1 }
 0x2b0   :  { %v406_v10 = vadd.f32 %v560_v9, %v309_v6  ;;  %v400_v11 = vpop.f32.mrb[5].mxu1 }
 0x2b1   :  { %v401_v12 = vadd.f32 %v400_v11, %v304_v5 }
 0x2b2   :  { %v420_v14 = vmax.f32 %v406_v10, 0.0 }
 0x2b3   :  { %v419_v16 = vmax.f32 %v401_v12, 0.0  ;;  %v563_v17 = vpop.f32.mrb[6].mxu1 }
 0x2b4   :  { %v448_v18 = vmul.f32 %v435_v15, %v420_v14  ;;  %v416_v19 = vadd.f32 %v563_v17, %v319_v8  ;;  %v410_v20 = vpop.f32.mrb[7].mxu1 }
 0x2b5   :  { %v447_v21 = vmul.f32 %v430_v13, %v419_v16  ;;  %v411_v22 = vadd.f32 %v410_v20, %v314_v7 }
 0x2b6   :  { %v422_v24 = vmax.f32 %v416_v19, 0.0 }
 0x2b7   :  { %v451_v23 = vadd.f32 %v448_v18, %v447_v21  ;;  %v421_v25 = vmax.f32 %v411_v22, 0.0 }
 0x2b8   :  { %v450_v29 = vmul.f32 %v445_v28, %v422_v24 }
 0x2b9   :  { %v449_v27 = vmul.f32 %v440_v26, %v421_v25 }
 0x2bb   :  { %v452_v30 = vadd.f32 %v451_v23, %v449_v27 }
 0x2bd   :  { %v453_v32 = vadd.f32 %v452_v30, %v450_v29 }
 0x2bf   :  { %v454_v33 = vrot.slane %v453_v32, 4 }
 0x2c1   :  { %v455_v35 = vadd.f32 %v454_v33, %v453_v32 }
 0x2c3   :  { %v456_v36 = vrot.slane %v455_v35, 2 }
 0x2c5   :  { %v457_v38 = vadd.f32 %v456_v36, %v455_v35 }
 0x2c7   :  { %v458_v40 = vrot.slane %v457_v38, 1 }
 0x2c9   :  { %v459_v42 = vadd.f32 %v458_v40, %v457_v38 }
 0x2cb   :  { %v470_v43 = vadd.f32 %v469_v41, %v459_v42 }
 0x2cd   :  { %471 = vst [vmem:[%s761_s8] sm:$0x1] %v470_v43 }

</bundles_post_ra>
